<compile_context>
chip_gen: v7x
topology: tpu7x:2x2x1
jax: 0.10.0
libtpu: 0.0.40
codegen_flags: <defaults>
</compile_context>

<pallas_src>
import functools

import jax
import jax.numpy as jnp
from jax.experimental import pallas as pl
from jax.experimental.pallas import tpu as pltpu


def ms_kernel(w_ref, b_ref, x_ref, beta_ref, gamma_ref, o_ref, *, H, W, fma_dtype):
    # w_ref:     SMEM (36,)  spectrally-normalized conv weight, flat [oc, ic, kh, kw]
    # b_ref:     SMEM (2,)   conv bias
    # x_ref:     VMEM (NB, C, HW)
    # beta_ref:  VMEM (NB, 1, HW)
    # gamma_ref: VMEM (NB, 1, HW)
    # o_ref:     VMEM (NB, C, HW)
    NB = x_ref.shape[0]
    HW = H * W

    # Squeeze the singleton conv-channel dim once so the whole 3x3 tap loop
    # runs on sublane-dense (NB, HW) tiles, then stack beta/gamma so every tap
    # needs a single roll + single masked select for both input channels.
    beta = beta_ref[...].reshape(NB, HW).astype(jnp.float32)
    gamma = gamma_ref[...].reshape(NB, HW).astype(jnp.float32)
    stacked = jnp.stack([beta, gamma], axis=0)            # (2, NB, HW)

    # Flat position / column index for the zero-"same"-padding halo masks.
    pos = jax.lax.broadcasted_iota(jnp.int32, (1, 1, HW), 2)
    if W & (W - 1) == 0:                                  # power-of-two W: bit mask
        col = pos & (W - 1)
    else:                                                 # general W: cheap remainder
        col = pos - W * (pos // W)

    # Hoisted boundary masks; combined per tap with &.
    row_ok = {-1: pos >= W, 0: None, 1: pos < (H - 1) * W}
    col_ok = {-1: col >= 1, 0: None, 1: col < (W - 1)}

    # output channel 0 -> mu, output channel 1 -> std (torch.split order)
    acc_mu = jnp.zeros((NB, HW), jnp.float32) + b_ref[0]
    acc_std = jnp.zeros((NB, HW), jnp.float32) + b_ref[1]

    for kh in range(3):
        for kw in range(3):
            dr, dc = kh - 1, kw - 1
            off = dr * W + dc                             # flat tap offset
            shift = (-off) % HW                           # rolled[p] = plane[p + off]
            tap = stacked if off == 0 else pltpu.roll(stacked, shift=shift, axis=2)
            mask = row_ok[dr]
            if col_ok[dc] is not None:
                mask = col_ok[dc] if mask is None else (mask & col_ok[dc])
            if mask is not None:
                tap = jnp.where(mask, tap, 0.0)           # (1,1,HW) mask broadcasts
            tap_b, tap_g = tap[0], tap[1]                 # (NB, HW) each
            k = kh * 3 + kw
            acc_mu = acc_mu + w_ref[0 + k] * tap_b + w_ref[9 + k] * tap_g
            acc_std = acc_std + w_ref[18 + k] * tap_b + w_ref[27 + k] * tap_g

    # Final FMA: bf16-native on bf16 inputs (v6e/v7x bf16 VALU; v5e's compiler
    # widens internally), f32 otherwise.  Only the small mu/std planes convert.
    mu = acc_mu.astype(fma_dtype)[:, None, :]             # (NB, 1, HW)
    std = acc_std.astype(fma_dtype)[:, None, :]
    x = x_ref[...].astype(fma_dtype)                      # no-op for matching dtype
    o_ref[...] = (x * std + mu).astype(o_ref.dtype)


def _spectral_sigma(w_mat, eps=1e-12):
    """Exact largest singular value of a 2 x K matrix via its 2x2 Gram matrix."""
    g = w_mat @ w_mat.T
    tr = g[0, 0] + g[1, 1]
    det = g[0, 0] * g[1, 1] - g[0, 1] * g[1, 0]
    disc = jnp.sqrt(jnp.maximum(tr * tr - 4.0 * det, 0.0))
    sigma = jnp.sqrt(jnp.maximum(0.5 * (tr + disc), 0.0))
    return jnp.maximum(sigma, eps)                        # guard all-zero weight


def _pick_batch_block(N, C, HW, itemsize, budget_bytes=3 << 20):
    """Largest divisor of N whose per-step working set fits a small VMEM budget.

    A few MiB of tiles already reaches the HBM roofline for this mem-bound
    kernel; bigger blocks only shrink the grid (hurting DMA/compute overlap
    and v7x two-TensorCore sharding).
    """
    f32 = 4
    per_nb = (
        2 * itemsize * 2 * C * HW          # x + out tiles, double-buffered
        + 2 * itemsize * 2 * 8 * HW        # beta + gamma tiles (sublane-padded), dbl-buffered
        + f32 * HW * 10                    # in-kernel f32 temporaries (stack/tap/accs/masks)
    )
    nb = int(max(1, budget_bytes // max(per_nb, 1)))
    nb = min(nb, N)
    if N >= 2:
        nb = min(nb, N // 2)               # keep grid >= 2 so both v7x TCs get work
    nb = max(nb, 1)
    while N % nb:                          # exact divisor keeps every block full
        nb -= 1
    return nb


def ms_forward(x, beta, gamma, conv_w, conv_b):
    """x: (N,C,H,W), beta/gamma: (N,1,H,W), conv_w: (2,2,3,3), conv_b: (2,)."""
    N, C, H, W = x.shape
    HW = H * W

    # --- spectral norm of the conv weight (parameter glue, closed form) ---
    sigma = _spectral_sigma(conv_w.reshape(2, -1).astype(jnp.float32))
    w_sn = (conv_w.astype(jnp.float32) / sigma).reshape(-1)        # (36,)

    # Lane-dense layout: fold (H, W) -> H*W (pure metadata reshape, no copy).
    # TODO(synk): if H*W is not a multiple of 128 the big output store becomes
    # a masked vst; pad/choose spatial shapes upstream in that case.
    x_f = x.reshape(N, C, HW)
    beta_f = beta.reshape(N, 1, HW)
    gamma_f = gamma.reshape(N, 1, HW)

    nb = _pick_batch_block(N, C, HW, x.dtype.itemsize)
    grid = (N // nb,)

    fma_dtype = jnp.bfloat16 if x.dtype == jnp.bfloat16 else jnp.float32
    kernel = functools.partial(ms_kernel, H=H, W=W, fma_dtype=fma_dtype)
    out_f = pl.pallas_call(
        kernel,
        out_shape=jax.ShapeDtypeStruct((N, C, HW), x.dtype),
        grid=grid,
        in_specs=[
            pl.BlockSpec(memory_space=pltpu.MemorySpace.SMEM),     # w_sn (36,)
            pl.BlockSpec(memory_space=pltpu.MemorySpace.SMEM),     # bias (2,)
            pl.BlockSpec((nb, C, HW), lambda b: (b, 0, 0)),        # x
            pl.BlockSpec((nb, 1, HW), lambda b: (b, 0, 0)),        # beta
            pl.BlockSpec((nb, 1, HW), lambda b: (b, 0, 0)),        # gamma
        ],
        out_specs=pl.BlockSpec((nb, C, HW), lambda b: (b, 0, 0)),
        compiler_params=pltpu.CompilerParams(
            dimension_semantics=("parallel",),
            vmem_limit_bytes=32 * 1024 * 1024,
        ),
    )(w_sn, conv_b.astype(jnp.float32), x_f, beta_f, gamma_f)

    return out_f.reshape(N, C, H, W)


def ms_reference(x, beta, gamma, conv_w, conv_b):
    """Pure-JAX reference (independent SVD-based spectral norm) for checking."""
    w_mat = conv_w.reshape(2, -1)
    sigma = jnp.linalg.svd(w_mat, compute_uv=False)[0]
    w_sn = conv_w / sigma
    inputs = jnp.concatenate((beta, gamma), axis=1)                # (N,2,H,W)
    h = jax.lax.conv_general_dilated(
        inputs, w_sn, window_strides=(1, 1), padding=((1, 1), (1, 1)),
        dimension_numbers=("NCHW", "OIHW", "NCHW"))
    h = h + conv_b[None, :, None, None]
    mu = h[:, 0:1]
    std = h[:, 1:2]
    return x * std + mu


if __name__ == "__main__":
    key = jax.random.PRNGKey(0)
    k_x, k_b, k_g, k_w, k_bias = jax.random.split(key, 5)

    N, C, H, W = 2, 4, 16, 16          # dim_in = 4
    x = jax.random.normal(k_x, (N, C, H, W), jnp.float32)
    beta = jax.random.normal(k_b, (N, 1, H, W), jnp.float32)
    gamma = jax.random.normal(k_g, (N, 1, H, W), jnp.float32)

    # Deterministic synthetic Conv2d(2, 2, 3) parameters.
    conv_w = jax.random.normal(k_w, (2, 2, 3, 3), jnp.float32) * 0.2
    conv_b = jax.random.normal(k_bias, (2,), jnp.float32) * 0.1

    out = ms_forward(x, beta, gamma, conv_w, conv_b)
    out = jax.block_until_ready(out)

    ref = ms_reference(x, beta, gamma, conv_w, conv_b)
    assert out.shape == (N, C, H, W)
    assert jnp.allclose(out, ref, atol=1e-4, rtol=1e-4), "mismatch vs reference"

    print("KERNEL_OK")
</pallas_src>

<mosaic_0001>
module attributes {stable_mosaic.version = 11 : i64} {
  func.func @ms_kernel(%arg0: i32, %arg1: memref<36xf32, #tpu.memory_space<smem>>, %arg2: memref<2xf32, #tpu.memory_space<smem>>, %arg3: memref<1x4x256xf32, #tpu.memory_space<vmem>>, %arg4: memref<1x1x256xf32, #tpu.memory_space<vmem>>, %arg5: memref<1x1x256xf32, #tpu.memory_space<vmem>>, %arg6: memref<1x4x256xf32, #tpu.memory_space<vmem>>) attributes {dimension_semantics = [#tpu.dimension_semantics<parallel>], iteration_bounds = array<i64: 2>, scalar_prefetch = 0 : i64, scratch_operands = 0 : i64, tpu.core_type = #tpu.core_type<tc>, window_params = [{transform_indices = @transform_0, window_bounds = array<i64: 36>}, {transform_indices = @transform_1, window_bounds = array<i64: 2>}, {transform_indices = @transform_2, window_bounds = array<i64: 1, 4, 256>}, {transform_indices = @transform_3, window_bounds = array<i64: 1, 1, 256>}, {transform_indices = @transform_4, window_bounds = array<i64: 1, 1, 256>}, {transform_indices = @transform_5, window_bounds = array<i64: 1, 4, 256>}]} {
    %c0 = arith.constant 0 : index
    %c0_0 = arith.constant 0 : index
    %c0_1 = arith.constant 0 : index
    %0 = vector.load %arg4[%c0, %c0_0, %c0_1] : memref<1x1x256xf32, #tpu.memory_space<vmem>>, vector<1x1x256xf32>
    %1 = vector.shape_cast %0 : vector<1x1x256xf32> to vector<1x256xf32>
    %c0_2 = arith.constant 0 : index
    %c0_3 = arith.constant 0 : index
    %c0_4 = arith.constant 0 : index
    %2 = vector.load %arg5[%c0_2, %c0_3, %c0_4] : memref<1x1x256xf32, #tpu.memory_space<vmem>>, vector<1x1x256xf32>
    %3 = vector.shape_cast %2 : vector<1x1x256xf32> to vector<1x256xf32>
    %4 = vector.shape_cast %1 : vector<1x256xf32> to vector<1x1x256xf32>
    %5 = vector.shape_cast %3 : vector<1x256xf32> to vector<1x1x256xf32>
    %6 = tpu.concatenate %4, %5 in 0 : vector<1x1x256xf32>, vector<1x1x256xf32> -> vector<2x1x256xf32>
    %7 = tpu.iota {dimensions = array<i32: 2>} : vector<1x1x256xi32>
    %c15_i32 = arith.constant 15 : i32
    %8 = vector.broadcast %c15_i32 : i32 to vector<1x1x256xi32>
    %9 = arith.andi %7, %8 : vector<1x1x256xi32>
    %c16_i32 = arith.constant 16 : i32
    %10 = vector.broadcast %c16_i32 : i32 to vector<1x1x256xi32>
    %11 = arith.cmpi sge, %7, %10 : vector<1x1x256xi32>
    %c240_i32 = arith.constant 240 : i32
    %12 = vector.broadcast %c240_i32 : i32 to vector<1x1x256xi32>
    %13 = arith.cmpi slt, %7, %12 : vector<1x1x256xi32>
    %c1_i32 = arith.constant 1 : i32
    %14 = vector.broadcast %c1_i32 : i32 to vector<1x1x256xi32>
    %15 = arith.cmpi sge, %9, %14 : vector<1x1x256xi32>
    %c15_i32_5 = arith.constant 15 : i32
    %16 = vector.broadcast %c15_i32_5 : i32 to vector<1x1x256xi32>
    %17 = arith.cmpi slt, %9, %16 : vector<1x1x256xi32>
    %cst = arith.constant 0.000000e+00 : f32
    %18 = vector.broadcast %cst : f32 to vector<1x256xf32>
    %c0_6 = arith.constant 0 : index
    %19 = memref.load %arg2[%c0_6] : memref<2xf32, #tpu.memory_space<smem>>
    %20 = vector.broadcast %19 : f32 to vector<1x256xf32>
    %21 = arith.addf %18, %20 : vector<1x256xf32>
    %cst_7 = arith.constant 0.000000e+00 : f32
    %22 = vector.broadcast %cst_7 : f32 to vector<1x256xf32>
    %c1 = arith.constant 1 : index
    %23 = memref.load %arg2[%c1] : memref<2xf32, #tpu.memory_space<smem>>
    %24 = vector.broadcast %23 : f32 to vector<1x256xf32>
    %25 = arith.addf %22, %24 : vector<1x256xf32>
    %c17_i32 = arith.constant 17 : i32
    %26 = tpu.dynamic_rotate %6 by %c17_i32 dim 2 : vector<2x1x256xf32>, i32 -> vector<2x1x256xf32>
    %27 = arith.andi %11, %15 : vector<1x1x256xi1>
    %cst_8 = arith.constant 0.000000e+00 : f32
    %28 = vector.shape_cast %27 : vector<1x1x256xi1> to vector<1x1x256xi1>
    %29 = vector.broadcast %28 : vector<1x1x256xi1> to vector<2x1x256xi1>
    %30 = vector.broadcast %cst_8 : f32 to vector<2x1x256xf32>
    %31 = arith.select %29, %26, %30 : vector<2x1x256xi1>, vector<2x1x256xf32>
    %32 = vector.extract_strided_slice %31 {offsets = [0, 0, 0], sizes = [1, 1, 256], strides = [1, 1, 1]} : vector<2x1x256xf32> to vector<1x1x256xf32>
    %33 = vector.shape_cast %32 : vector<1x1x256xf32> to vector<1x256xf32>
    %34 = vector.extract_strided_slice %31 {offsets = [1, 0, 0], sizes = [1, 1, 256], strides = [1, 1, 1]} : vector<2x1x256xf32> to vector<1x1x256xf32>
    %35 = vector.shape_cast %34 : vector<1x1x256xf32> to vector<1x256xf32>
    %c0_9 = arith.constant 0 : index
    %36 = memref.load %arg1[%c0_9] : memref<36xf32, #tpu.memory_space<smem>>
    %37 = vector.broadcast %36 : f32 to vector<1x256xf32>
    %38 = arith.mulf %37, %33 : vector<1x256xf32>
    %39 = arith.addf %21, %38 : vector<1x256xf32>
    %c9 = arith.constant 9 : index
    %40 = memref.load %arg1[%c9] : memref<36xf32, #tpu.memory_space<smem>>
    %41 = vector.broadcast %40 : f32 to vector<1x256xf32>
    %42 = arith.mulf %41, %35 : vector<1x256xf32>
    %43 = arith.addf %39, %42 : vector<1x256xf32>
    %c18 = arith.constant 18 : index
    %44 = memref.load %arg1[%c18] : memref<36xf32, #tpu.memory_space<smem>>
    %45 = vector.broadcast %44 : f32 to vector<1x256xf32>
    %46 = arith.mulf %45, %33 : vector<1x256xf32>
    %47 = arith.addf %25, %46 : vector<1x256xf32>
    %c27 = arith.constant 27 : index
    %48 = memref.load %arg1[%c27] : memref<36xf32, #tpu.memory_space<smem>>
    %49 = vector.broadcast %48 : f32 to vector<1x256xf32>
    %50 = arith.mulf %49, %35 : vector<1x256xf32>
    %51 = arith.addf %47, %50 : vector<1x256xf32>
    %c16_i32_10 = arith.constant 16 : i32
    %52 = tpu.dynamic_rotate %6 by %c16_i32_10 dim 2 : vector<2x1x256xf32>, i32 -> vector<2x1x256xf32>
    %cst_11 = arith.constant 0.000000e+00 : f32
    %53 = vector.shape_cast %11 : vector<1x1x256xi1> to vector<1x1x256xi1>
    %54 = vector.broadcast %53 : vector<1x1x256xi1> to vector<2x1x256xi1>
    %55 = vector.broadcast %cst_11 : f32 to vector<2x1x256xf32>
    %56 = arith.select %54, %52, %55 : vector<2x1x256xi1>, vector<2x1x256xf32>
    %57 = vector.extract_strided_slice %56 {offsets = [0, 0, 0], sizes = [1, 1, 256], strides = [1, 1, 1]} : vector<2x1x256xf32> to vector<1x1x256xf32>
    %58 = vector.shape_cast %57 : vector<1x1x256xf32> to vector<1x256xf32>
    %59 = vector.extract_strided_slice %56 {offsets = [1, 0, 0], sizes = [1, 1, 256], strides = [1, 1, 1]} : vector<2x1x256xf32> to vector<1x1x256xf32>
    %60 = vector.shape_cast %59 : vector<1x1x256xf32> to vector<1x256xf32>
    %c1_12 = arith.constant 1 : index
    %61 = memref.load %arg1[%c1_12] : memref<36xf32, #tpu.memory_space<smem>>
    %62 = vector.broadcast %61 : f32 to vector<1x256xf32>
    %63 = arith.mulf %62, %58 : vector<1x256xf32>
    %64 = arith.addf %43, %63 : vector<1x256xf32>
    %c10 = arith.constant 10 : index
    %65 = memref.load %arg1[%c10] : memref<36xf32, #tpu.memory_space<smem>>
    %66 = vector.broadcast %65 : f32 to vector<1x256xf32>
    %67 = arith.mulf %66, %60 : vector<1x256xf32>
    %68 = arith.addf %64, %67 : vector<1x256xf32>
    %c19 = arith.constant 19 : index
    %69 = memref.load %arg1[%c19] : memref<36xf32, #tpu.memory_space<smem>>
    %70 = vector.broadcast %69 : f32 to vector<1x256xf32>
    %71 = arith.mulf %70, %58 : vector<1x256xf32>
    %72 = arith.addf %51, %71 : vector<1x256xf32>
    %c28 = arith.constant 28 : index
    %73 = memref.load %arg1[%c28] : memref<36xf32, #tpu.memory_space<smem>>
    %74 = vector.broadcast %73 : f32 to vector<1x256xf32>
    %75 = arith.mulf %74, %60 : vector<1x256xf32>
    %76 = arith.addf %72, %75 : vector<1x256xf32>
    %c15_i32_13 = arith.constant 15 : i32
    %77 = tpu.dynamic_rotate %6 by %c15_i32_13 dim 2 : vector<2x1x256xf32>, i32 -> vector<2x1x256xf32>
    %78 = arith.andi %11, %17 : vector<1x1x256xi1>
    %cst_14 = arith.constant 0.000000e+00 : f32
    %79 = vector.shape_cast %78 : vector<1x1x256xi1> to vector<1x1x256xi1>
    %80 = vector.broadcast %79 : vector<1x1x256xi1> to vector<2x1x256xi1>
    %81 = vector.broadcast %cst_14 : f32 to vector<2x1x256xf32>
    %82 = arith.select %80, %77, %81 : vector<2x1x256xi1>, vector<2x1x256xf32>
    %83 = vector.extract_strided_slice %82 {offsets = [0, 0, 0], sizes = [1, 1, 256], strides = [1, 1, 1]} : vector<2x1x256xf32> to vector<1x1x256xf32>
    %84 = vector.shape_cast %83 : vector<1x1x256xf32> to vector<1x256xf32>
    %85 = vector.extract_strided_slice %82 {offsets = [1, 0, 0], sizes = [1, 1, 256], strides = [1, 1, 1]} : vector<2x1x256xf32> to vector<1x1x256xf32>
    %86 = vector.shape_cast %85 : vector<1x1x256xf32> to vector<1x256xf32>
    %c2 = arith.constant 2 : index
    %87 = memref.load %arg1[%c2] : memref<36xf32, #tpu.memory_space<smem>>
    %88 = vector.broadcast %87 : f32 to vector<1x256xf32>
    %89 = arith.mulf %88, %84 : vector<1x256xf32>
    %90 = arith.addf %68, %89 : vector<1x256xf32>
    %c11 = arith.constant 11 : index
    %91 = memref.load %arg1[%c11] : memref<36xf32, #tpu.memory_space<smem>>
    %92 = vector.broadcast %91 : f32 to vector<1x256xf32>
    %93 = arith.mulf %92, %86 : vector<1x256xf32>
    %94 = arith.addf %90, %93 : vector<1x256xf32>
    %c20 = arith.constant 20 : index
    %95 = memref.load %arg1[%c20] : memref<36xf32, #tpu.memory_space<smem>>
    %96 = vector.broadcast %95 : f32 to vector<1x256xf32>
    %97 = arith.mulf %96, %84 : vector<1x256xf32>
    %98 = arith.addf %76, %97 : vector<1x256xf32>
    %c29 = arith.constant 29 : index
    %99 = memref.load %arg1[%c29] : memref<36xf32, #tpu.memory_space<smem>>
    %100 = vector.broadcast %99 : f32 to vector<1x256xf32>
    %101 = arith.mulf %100, %86 : vector<1x256xf32>
    %102 = arith.addf %98, %101 : vector<1x256xf32>
    %c1_i32_15 = arith.constant 1 : i32
    %103 = tpu.dynamic_rotate %6 by %c1_i32_15 dim 2 : vector<2x1x256xf32>, i32 -> vector<2x1x256xf32>
    %cst_16 = arith.constant 0.000000e+00 : f32
    %104 = vector.shape_cast %15 : vector<1x1x256xi1> to vector<1x1x256xi1>
    %105 = vector.broadcast %104 : vector<1x1x256xi1> to vector<2x1x256xi1>
    %106 = vector.broadcast %cst_16 : f32 to vector<2x1x256xf32>
    %107 = arith.select %105, %103, %106 : vector<2x1x256xi1>, vector<2x1x256xf32>
    %108 = vector.extract_strided_slice %107 {offsets = [0, 0, 0], sizes = [1, 1, 256], strides = [1, 1, 1]} : vector<2x1x256xf32> to vector<1x1x256xf32>
    %109 = vector.shape_cast %108 : vector<1x1x256xf32> to vector<1x256xf32>
    %110 = vector.extract_strided_slice %107 {offsets = [1, 0, 0], sizes = [1, 1, 256], strides = [1, 1, 1]} : vector<2x1x256xf32> to vector<1x1x256xf32>
    %111 = vector.shape_cast %110 : vector<1x1x256xf32> to vector<1x256xf32>
    %c3 = arith.constant 3 : index
    %112 = memref.load %arg1[%c3] : memref<36xf32, #tpu.memory_space<smem>>
    %113 = vector.broadcast %112 : f32 to vector<1x256xf32>
    %114 = arith.mulf %113, %109 : vector<1x256xf32>
    %115 = arith.addf %94, %114 : vector<1x256xf32>
    %c12 = arith.constant 12 : index
    %116 = memref.load %arg1[%c12] : memref<36xf32, #tpu.memory_space<smem>>
    %117 = vector.broadcast %116 : f32 to vector<1x256xf32>
    %118 = arith.mulf %117, %111 : vector<1x256xf32>
    %119 = arith.addf %115, %118 : vector<1x256xf32>
    %c21 = arith.constant 21 : index
    %120 = memref.load %arg1[%c21] : memref<36xf32, #tpu.memory_space<smem>>
    %121 = vector.broadcast %120 : f32 to vector<1x256xf32>
    %122 = arith.mulf %121, %109 : vector<1x256xf32>
    %123 = arith.addf %102, %122 : vector<1x256xf32>
    %c30 = arith.constant 30 : index
    %124 = memref.load %arg1[%c30] : memref<36xf32, #tpu.memory_space<smem>>
    %125 = vector.broadcast %124 : f32 to vector<1x256xf32>
    %126 = arith.mulf %125, %111 : vector<1x256xf32>
    %127 = arith.addf %123, %126 : vector<1x256xf32>
    %128 = vector.extract_strided_slice %6 {offsets = [0, 0, 0], sizes = [1, 1, 256], strides = [1, 1, 1]} : vector<2x1x256xf32> to vector<1x1x256xf32>
    %129 = vector.shape_cast %128 : vector<1x1x256xf32> to vector<1x256xf32>
    %130 = vector.extract_strided_slice %6 {offsets = [1, 0, 0], sizes = [1, 1, 256], strides = [1, 1, 1]} : vector<2x1x256xf32> to vector<1x1x256xf32>
    %131 = vector.shape_cast %130 : vector<1x1x256xf32> to vector<1x256xf32>
    %c4 = arith.constant 4 : index
    %132 = memref.load %arg1[%c4] : memref<36xf32, #tpu.memory_space<smem>>
    %133 = vector.broadcast %132 : f32 to vector<1x256xf32>
    %134 = arith.mulf %133, %129 : vector<1x256xf32>
    %135 = arith.addf %119, %134 : vector<1x256xf32>
    %c13 = arith.constant 13 : index
    %136 = memref.load %arg1[%c13] : memref<36xf32, #tpu.memory_space<smem>>
    %137 = vector.broadcast %136 : f32 to vector<1x256xf32>
    %138 = arith.mulf %137, %131 : vector<1x256xf32>
    %139 = arith.addf %135, %138 : vector<1x256xf32>
    %c22 = arith.constant 22 : index
    %140 = memref.load %arg1[%c22] : memref<36xf32, #tpu.memory_space<smem>>
    %141 = vector.broadcast %140 : f32 to vector<1x256xf32>
    %142 = arith.mulf %141, %129 : vector<1x256xf32>
    %143 = arith.addf %127, %142 : vector<1x256xf32>
    %c31 = arith.constant 31 : index
    %144 = memref.load %arg1[%c31] : memref<36xf32, #tpu.memory_space<smem>>
    %145 = vector.broadcast %144 : f32 to vector<1x256xf32>
    %146 = arith.mulf %145, %131 : vector<1x256xf32>
    %147 = arith.addf %143, %146 : vector<1x256xf32>
    %c255_i32 = arith.constant 255 : i32
    %148 = tpu.dynamic_rotate %6 by %c255_i32 dim 2 : vector<2x1x256xf32>, i32 -> vector<2x1x256xf32>
    %cst_17 = arith.constant 0.000000e+00 : f32
    %149 = vector.shape_cast %17 : vector<1x1x256xi1> to vector<1x1x256xi1>
    %150 = vector.broadcast %149 : vector<1x1x256xi1> to vector<2x1x256xi1>
    %151 = vector.broadcast %cst_17 : f32 to vector<2x1x256xf32>
    %152 = arith.select %150, %148, %151 : vector<2x1x256xi1>, vector<2x1x256xf32>
    %153 = vector.extract_strided_slice %152 {offsets = [0, 0, 0], sizes = [1, 1, 256], strides = [1, 1, 1]} : vector<2x1x256xf32> to vector<1x1x256xf32>
    %154 = vector.shape_cast %153 : vector<1x1x256xf32> to vector<1x256xf32>
    %155 = vector.extract_strided_slice %152 {offsets = [1, 0, 0], sizes = [1, 1, 256], strides = [1, 1, 1]} : vector<2x1x256xf32> to vector<1x1x256xf32>
    %156 = vector.shape_cast %155 : vector<1x1x256xf32> to vector<1x256xf32>
    %c5 = arith.constant 5 : index
    %157 = memref.load %arg1[%c5] : memref<36xf32, #tpu.memory_space<smem>>
    %158 = vector.broadcast %157 : f32 to vector<1x256xf32>
    %159 = arith.mulf %158, %154 : vector<1x256xf32>
    %160 = arith.addf %139, %159 : vector<1x256xf32>
    %c14 = arith.constant 14 : index
    %161 = memref.load %arg1[%c14] : memref<36xf32, #tpu.memory_space<smem>>
    %162 = vector.broadcast %161 : f32 to vector<1x256xf32>
    %163 = arith.mulf %162, %156 : vector<1x256xf32>
    %164 = arith.addf %160, %163 : vector<1x256xf32>
    %c23 = arith.constant 23 : index
    %165 = memref.load %arg1[%c23] : memref<36xf32, #tpu.memory_space<smem>>
    %166 = vector.broadcast %165 : f32 to vector<1x256xf32>
    %167 = arith.mulf %166, %154 : vector<1x256xf32>
    %168 = arith.addf %147, %167 : vector<1x256xf32>
    %c32 = arith.constant 32 : index
    %169 = memref.load %arg1[%c32] : memref<36xf32, #tpu.memory_space<smem>>
    %170 = vector.broadcast %169 : f32 to vector<1x256xf32>
    %171 = arith.mulf %170, %156 : vector<1x256xf32>
    %172 = arith.addf %168, %171 : vector<1x256xf32>
    %c241_i32 = arith.constant 241 : i32
    %173 = tpu.dynamic_rotate %6 by %c241_i32 dim 2 : vector<2x1x256xf32>, i32 -> vector<2x1x256xf32>
    %174 = arith.andi %13, %15 : vector<1x1x256xi1>
    %cst_18 = arith.constant 0.000000e+00 : f32
    %175 = vector.shape_cast %174 : vector<1x1x256xi1> to vector<1x1x256xi1>
    %176 = vector.broadcast %175 : vector<1x1x256xi1> to vector<2x1x256xi1>
    %177 = vector.broadcast %cst_18 : f32 to vector<2x1x256xf32>
    %178 = arith.select %176, %173, %177 : vector<2x1x256xi1>, vector<2x1x256xf32>
    %179 = vector.extract_strided_slice %178 {offsets = [0, 0, 0], sizes = [1, 1, 256], strides = [1, 1, 1]} : vector<2x1x256xf32> to vector<1x1x256xf32>
    %180 = vector.shape_cast %179 : vector<1x1x256xf32> to vector<1x256xf32>
    %181 = vector.extract_strided_slice %178 {offsets = [1, 0, 0], sizes = [1, 1, 256], strides = [1, 1, 1]} : vector<2x1x256xf32> to vector<1x1x256xf32>
    %182 = vector.shape_cast %181 : vector<1x1x256xf32> to vector<1x256xf32>
    %c6 = arith.constant 6 : index
    %183 = memref.load %arg1[%c6] : memref<36xf32, #tpu.memory_space<smem>>
    %184 = vector.broadcast %183 : f32 to vector<1x256xf32>
    %185 = arith.mulf %184, %180 : vector<1x256xf32>
    %186 = arith.addf %164, %185 : vector<1x256xf32>
    %c15 = arith.constant 15 : index
    %187 = memref.load %arg1[%c15] : memref<36xf32, #tpu.memory_space<smem>>
    %188 = vector.broadcast %187 : f32 to vector<1x256xf32>
    %189 = arith.mulf %188, %182 : vector<1x256xf32>
    %190 = arith.addf %186, %189 : vector<1x256xf32>
    %c24 = arith.constant 24 : index
    %191 = memref.load %arg1[%c24] : memref<36xf32, #tpu.memory_space<smem>>
    %192 = vector.broadcast %191 : f32 to vector<1x256xf32>
    %193 = arith.mulf %192, %180 : vector<1x256xf32>
    %194 = arith.addf %172, %193 : vector<1x256xf32>
    %c33 = arith.constant 33 : index
    %195 = memref.load %arg1[%c33] : memref<36xf32, #tpu.memory_space<smem>>
    %196 = vector.broadcast %195 : f32 to vector<1x256xf32>
    %197 = arith.mulf %196, %182 : vector<1x256xf32>
    %198 = arith.addf %194, %197 : vector<1x256xf32>
    %c240_i32_19 = arith.constant 240 : i32
    %199 = tpu.dynamic_rotate %6 by %c240_i32_19 dim 2 : vector<2x1x256xf32>, i32 -> vector<2x1x256xf32>
    %cst_20 = arith.constant 0.000000e+00 : f32
    %200 = vector.shape_cast %13 : vector<1x1x256xi1> to vector<1x1x256xi1>
    %201 = vector.broadcast %200 : vector<1x1x256xi1> to vector<2x1x256xi1>
    %202 = vector.broadcast %cst_20 : f32 to vector<2x1x256xf32>
    %203 = arith.select %201, %199, %202 : vector<2x1x256xi1>, vector<2x1x256xf32>
    %204 = vector.extract_strided_slice %203 {offsets = [0, 0, 0], sizes = [1, 1, 256], strides = [1, 1, 1]} : vector<2x1x256xf32> to vector<1x1x256xf32>
    %205 = vector.shape_cast %204 : vector<1x1x256xf32> to vector<1x256xf32>
    %206 = vector.extract_strided_slice %203 {offsets = [1, 0, 0], sizes = [1, 1, 256], strides = [1, 1, 1]} : vector<2x1x256xf32> to vector<1x1x256xf32>
    %207 = vector.shape_cast %206 : vector<1x1x256xf32> to vector<1x256xf32>
    %c7 = arith.constant 7 : index
    %208 = memref.load %arg1[%c7] : memref<36xf32, #tpu.memory_space<smem>>
    %209 = vector.broadcast %208 : f32 to vector<1x256xf32>
    %210 = arith.mulf %209, %205 : vector<1x256xf32>
    %211 = arith.addf %190, %210 : vector<1x256xf32>
    %c16 = arith.constant 16 : index
    %212 = memref.load %arg1[%c16] : memref<36xf32, #tpu.memory_space<smem>>
    %213 = vector.broadcast %212 : f32 to vector<1x256xf32>
    %214 = arith.mulf %213, %207 : vector<1x256xf32>
    %215 = arith.addf %211, %214 : vector<1x256xf32>
    %c25 = arith.constant 25 : index
    %216 = memref.load %arg1[%c25] : memref<36xf32, #tpu.memory_space<smem>>
    %217 = vector.broadcast %216 : f32 to vector<1x256xf32>
    %218 = arith.mulf %217, %205 : vector<1x256xf32>
    %219 = arith.addf %198, %218 : vector<1x256xf32>
    %c34 = arith.constant 34 : index
    %220 = memref.load %arg1[%c34] : memref<36xf32, #tpu.memory_space<smem>>
    %221 = vector.broadcast %220 : f32 to vector<1x256xf32>
    %222 = arith.mulf %221, %207 : vector<1x256xf32>
    %223 = arith.addf %219, %222 : vector<1x256xf32>
    %c239_i32 = arith.constant 239 : i32
    %224 = tpu.dynamic_rotate %6 by %c239_i32 dim 2 : vector<2x1x256xf32>, i32 -> vector<2x1x256xf32>
    %225 = arith.andi %13, %17 : vector<1x1x256xi1>
    %cst_21 = arith.constant 0.000000e+00 : f32
    %226 = vector.shape_cast %225 : vector<1x1x256xi1> to vector<1x1x256xi1>
    %227 = vector.broadcast %226 : vector<1x1x256xi1> to vector<2x1x256xi1>
    %228 = vector.broadcast %cst_21 : f32 to vector<2x1x256xf32>
    %229 = arith.select %227, %224, %228 : vector<2x1x256xi1>, vector<2x1x256xf32>
    %230 = vector.extract_strided_slice %229 {offsets = [0, 0, 0], sizes = [1, 1, 256], strides = [1, 1, 1]} : vector<2x1x256xf32> to vector<1x1x256xf32>
    %231 = vector.shape_cast %230 : vector<1x1x256xf32> to vector<1x256xf32>
    %232 = vector.extract_strided_slice %229 {offsets = [1, 0, 0], sizes = [1, 1, 256], strides = [1, 1, 1]} : vector<2x1x256xf32> to vector<1x1x256xf32>
    %233 = vector.shape_cast %232 : vector<1x1x256xf32> to vector<1x256xf32>
    %c8 = arith.constant 8 : index
    %234 = memref.load %arg1[%c8] : memref<36xf32, #tpu.memory_space<smem>>
    %235 = vector.broadcast %234 : f32 to vector<1x256xf32>
    %236 = arith.mulf %235, %231 : vector<1x256xf32>
    %237 = arith.addf %215, %236 : vector<1x256xf32>
    %c17 = arith.constant 17 : index
    %238 = memref.load %arg1[%c17] : memref<36xf32, #tpu.memory_space<smem>>
    %239 = vector.broadcast %238 : f32 to vector<1x256xf32>
    %240 = arith.mulf %239, %233 : vector<1x256xf32>
    %241 = arith.addf %237, %240 : vector<1x256xf32>
    %c26 = arith.constant 26 : index
    %242 = memref.load %arg1[%c26] : memref<36xf32, #tpu.memory_space<smem>>
    %243 = vector.broadcast %242 : f32 to vector<1x256xf32>
    %244 = arith.mulf %243, %231 : vector<1x256xf32>
    %245 = arith.addf %223, %244 : vector<1x256xf32>
    %c35 = arith.constant 35 : index
    %246 = memref.load %arg1[%c35] : memref<36xf32, #tpu.memory_space<smem>>
    %247 = vector.broadcast %246 : f32 to vector<1x256xf32>
    %248 = arith.mulf %247, %233 : vector<1x256xf32>
    %249 = arith.addf %245, %248 : vector<1x256xf32>
    %250 = vector.shape_cast %241 : vector<1x256xf32> to vector<1x1x256xf32>
    %251 = vector.shape_cast %249 : vector<1x256xf32> to vector<1x1x256xf32>
    %c0_22 = arith.constant 0 : index
    %c0_23 = arith.constant 0 : index
    %c0_24 = arith.constant 0 : index
    %252 = vector.load %arg3[%c0_22, %c0_23, %c0_24] : memref<1x4x256xf32, #tpu.memory_space<vmem>>, vector<1x4x256xf32>
    %253 = vector.broadcast %251 : vector<1x1x256xf32> to vector<1x4x256xf32>
    %254 = arith.mulf %252, %253 : vector<1x4x256xf32>
    %255 = vector.broadcast %250 : vector<1x1x256xf32> to vector<1x4x256xf32>
    %256 = arith.addf %254, %255 : vector<1x4x256xf32>
    %c0_25 = arith.constant 0 : index
    %c0_26 = arith.constant 0 : index
    %c0_27 = arith.constant 0 : index
    %257 = vector.load %arg6[%c0_25, %c0_26, %c0_27] : memref<1x4x256xf32, #tpu.memory_space<vmem>>, vector<1x4x256xf32>
    tpu.vector_store %arg6[%c0_25, %c0_26, %c0_27], %256 {strides = array<i32>} : memref<1x4x256xf32, #tpu.memory_space<vmem>>, vector<1x4x256xf32>,
    return
  }
  func.func @transform_0(%arg0: i32) -> i32 {
    %c0_i32 = arith.constant 0 : i32
    %c0_i32_0 = arith.constant 0 : i32
    return %c0_i32 : i32
  }
  func.func @transform_1(%arg0: i32) -> i32 {
    %c0_i32 = arith.constant 0 : i32
    %c0_i32_0 = arith.constant 0 : i32
    return %c0_i32 : i32
  }
  func.func @transform_2(%arg0: i32) -> (i32, i32, i32) {
    %c0_i32 = arith.constant 0 : i32
    %c0_i32_0 = arith.constant 0 : i32
    %c0_i32_1 = arith.constant 0 : i32
    return %arg0, %c0_i32, %c0_i32_0 : i32, i32, i32
  }
  func.func @transform_3(%arg0: i32) -> (i32, i32, i32) {
    %c0_i32 = arith.constant 0 : i32
    %c0_i32_0 = arith.constant 0 : i32
    %c0_i32_1 = arith.constant 0 : i32
    return %arg0, %c0_i32, %c0_i32_0 : i32, i32, i32
  }
  func.func @transform_4(%arg0: i32) -> (i32, i32, i32) {
    %c0_i32 = arith.constant 0 : i32
    %c0_i32_0 = arith.constant 0 : i32
    %c0_i32_1 = arith.constant 0 : i32
    return %arg0, %c0_i32, %c0_i32_0 : i32, i32, i32
  }
  func.func @transform_5(%arg0: i32) -> (i32, i32, i32) {
    %c0_i32 = arith.constant 0 : i32
    %c0_i32_0 = arith.constant 0 : i32
    %c0_i32_1 = arith.constant 0 : i32
    return %arg0, %c0_i32, %c0_i32_0 : i32, i32, i32
  }
}

</mosaic_0001>

<bundles_post_ra>
// kernel: tpu_custom_call.1
= control target key start
LH: loop header
LB: loop body
LE: loop exit
PB: predicated region body
PF: predicated region fallthrough
CT: control target
= control target key end

     0   :  { %10 = vsyncpa [#allocation5], 0  ;;  %s1815_s0 = inlined_call_operand.hbm [shape: f32[36], index: 0, kind: input, shape index: {}]   ;;  %s1816_s1 = inlined_call_operand.vmem [shape: f32[2], index: 1, kind: input, shape index: {}]   ;;  %s1817_s2 = inlined_call_operand.hbm [shape: f32[2,4,256], index: 2, kind: input, shape index: {}]   ;;  %s1818_s3 = inlined_call_operand.vmem [shape: f32[2,1,256], index: 3, kind: input, shape index: {}]   ;;  %s1819_s4 = inlined_call_operand.vmem [shape: f32[2,1,256], index: 4, kind: input, shape index: {}]   ;;  %s1820_s5 = inlined_call_operand.hbm [shape: f32[2,4,256], index: 5, kind: output, shape index: {}]  }
   0x1   :  { %11 = vsyncpa [#allocation6], 0 }
   0x2   :  { %12 = vsyncpa [#allocation3], 0 }
   0x3   :  { %14 = vsyncpa [#allocation3 + $0x1], 0 }
   0x4   :  { %15 = vsyncpa [#allocation4], 0 }
   0x5   :  { %17 = vsyncpa [#allocation4 + $0x1], 0  ;;  %s1245_s18 = smov 0   ;;  %s1247_s19 = smov 0  }
   0x6   :  { %s1249_s20 = smov 0   ;;  %s1251_s21 = smov 0  }
   0x7 LB: > { %s1266_s22 = sadd.s32 4294967295, %s1201_s21   ;;  %s936_s23 = sadd.s32 4294967294, %s1201_s21   ;;  %s1201_s21 = sphi %s1251_s21, %s1859_s21   ;;  %s1197_s20 = sphi %s1249_s20, %s1858_s20   ;;  %s1193_s19 = sphi %s1247_s19, %s1857_s19   ;;  %s1189_s18 = sphi %s1245_s18, %s1856_s18  }
   0x8   : > { %p85_p0 = scmp.ne.s32.totalorder %s1193_s19, %s1189_s18  ;;  %p1821_p1 = scmp.eq.s32.totalorder %s1266_s22, 0 }
   0x9   : > { %p167_p3 = scmp.eq.s32.totalorder %s936_s23, 1  ;;  %p937_p5 = scmp.ge.s32.totalorder %s1201_s21, 1 }
   0xa   : > { %p1275_p4 = por %p1821_p1, %p85_p0  ;;  %p174_p7 = scmp.lt.s32.totalorder %s1201_s21, 3 }
   0xb   : > { %p1280_p6 = por %p167_p3, %p85_p0  ;;  %s196_s29 = sshll.u32 %s1816_s1, 4  ;;  %s197_s29 = int_to_ptr.vmem [resolvable:$true] %s196_s29 }
   0xc   : > { %s1824_s24 = scalar_select %p1275_p4, 1, 0 }
   0xd   : > { %s1825_s25 = scalar_select %p1280_p6, 1, 0 }
   0xe   : > { %p1285_p8 = pnand %p937_p5, %p174_p7  ;;  %s1296_s30 = sadd.s32 1, %s1201_s21  }
   0xf   : > { %s69_s7 = ssub.s32 %s1201_s21, %s1296_s30  ;;  %s72_s8 = sadd.s32 1, %s1197_s20 }
  0x10   : > { %p1006_p10 = pneg %p1285_p8  ;;  %p1307_p12 = scmp.eq.s32.totalorder %s69_s7, 0 }
  0x11   : > { %s1069_s12 = scalar_lea.hbm %s1815_s0, 16 }
  0x12   : > { %p1300_p11 = pnand %p1006_p10, %p1821_p1  ;;  %p1070_p13 = scmp.ne.s32.totalorder %s1815_s0, %s1069_s12 }
  0x13   : > { %p1076_p7 = scmp.lt.u32.totalorder %s1069_s12, %s1815_s0 }
  0x14   : > { %p1071_p0 = pneg %p1300_p11 }
  0x16   : > { %p1072_p3 = pnand %p1071_p0, %p1070_p13 }
  0x18   : > { %p1073_p5 = pneg %p1072_p3 }
  0x1a   : > { %p1078_p10 = pnand %p1076_p7, %p1073_p5 }
  0x1c   : > { %1081 = shalt.err (!%p1078_p10)
}
  0x1d   : > { %s1203_s17 = smov [#allocation2]   ;;  %s1082_s28 = scalar_lea.vmem %s197_s29, 16 }
  0x1e   : > { %1009 = dma.hbm_to_smem (!%p1300_p11), %s1815_s0, 16, %s1203_s17, [#allocation5]  }
  0x1f   : > { %p1083_p9 = scmp.ne.s32.totalorder %s197_s29, %s1082_s28  ;;  %p1090_p6 = scmp.lt.s32.totalorder %s197_s29, %s197_s29 }
  0x20   : > { %p1091_p13 = scmp.lt.s32.totalorder %s1082_s28, %s1082_s28 }
  0x21   : > { %p1085_p1 = pnand %p1083_p9, %p1071_p0 }
  0x22   : > { %p1092_p3 = por %p1091_p13, %p1090_p6 }
  0x23   : > { %p1086_p2 = pneg %p1085_p1 }
  0x25   : > { %p1093_p4 = pnand %p1092_p3, %p1086_p2 }
  0x27   : > { %1096 = shalt.err (!%p1093_p4)
}
  0x28   : > { %s1204_s7 = smov [#allocation7]   ;;  %p79_p1 = scmp.ne.s32.totalorder %s1197_s20, %s1193_s19 }
  0x29   : > { %1012 = dma.vmem_to_smem (!%p1300_p11), %s197_s29, 16, %s1204_s7, [#allocation6]  }
  0x2a   : > { %s1332_s10 = scalar_select %p1307_p12, %s1197_s20, %s72_s8  }
  0x2b   : > { %p80_p6 = scmp.eq.s32.totalorder %s1201_s21, 0  ;;  %p1023_p2 = scmp.lt.s32.totalorder %s1201_s21, 2 }
  0x2c   : > { %s207_s11 = sand.u32 1, %s1197_s20   ;;  %p1829_p9 = scmp.eq.s32.totalorder %s1266_s22, 1 }
  0x2d   : > { %p81_p4 = por %p80_p6, %p79_p1  ;;  %s941_s12 = sshll.u32 %s207_s11, 3 }
  0x2e   : > { %p1341_p0 = por %p1829_p9, %p79_p1  ;;  %s992_s13 = sshll.u32 %s1201_s21, 7 }
  0x2f   : > { %s1349_s16 = scalar_lea.hbm %s1817_s2, %s992_s13  ;;  %s211_s29 = scalar_lea.vmem [#allocation8], %s941_s12 }
  0x30   : > { %s1830_s6 = scalar_select %p1341_p0, 1, 0 }
  0x31   : > { %s219_s8 = sshll.u32 %s211_s29, 4  ;;  %p1353_p11 = pnand %p1023_p2, %p81_p4  ;;  %s1351_s8 = int_to_ptr.vmem [resolvable:$true] %s219_s8 }
  0x32   : > { %s208_s17 = scalar_lea.sflag [#allocation3], %s207_s11  ;;  %s1097_s23 = scalar_lea.hbm %s1349_s16, 128 }
  0x33   : > { %p1098_p12 = scmp.ne.s32.totalorder %s1349_s16, %s1097_s23  ;;  %p1099_p5 = pneg %p1353_p11 }
  0x34   : > { %s1102_s7 = scalar_lea.hbm %s1817_s2, 256  ;;  %p1103_p13 = scmp.lt.u32.totalorder %s1349_s16, %s1817_s2 }
  0x35   : > { %p1100_p7 = pnand %p1099_p5, %p1098_p12  ;;  %p1104_p3 = scmp.lt.u32.totalorder %s1102_s7, %s1097_s23 }
  0x36   : > { %p1106_p6 = scmp.lt.u32.totalorder %s1097_s23, %s1349_s16 }
  0x37   : > { %p1101_p10 = pneg %p1100_p7  ;;  %p1105_p1 = por %p1104_p3, %p1103_p13 }
  0x39   : > { %p1107_p2 = por %p1106_p6, %p1105_p1 }
  0x3b   : > { %p1108_p4 = pnand %p1107_p2, %p1101_p10 }
  0x3d   : > { %1111 = shalt.err (!%p1108_p4)
}
  0x3e   : > { %s1112_s11 = scalar_lea.vmem %s1351_s8, 128  ;;  %s1205_s14 = smov [#allocation8]  }
  0x3f   : > { %p1113_p9 = scmp.ne.s32.totalorder %s1351_s8, %s1112_s11  ;;  %s1117_s15 = sshll.u32 %s1205_s14, 4  ;;  %s1118_s15 = int_to_ptr.vmem [resolvable:$false] %s1117_s15 }
  0x40   : > { %s1119_s29 = scalar_lea.vmem %s1118_s15, 256  ;;  %p1120_p0 = scmp.lt.s32.totalorder %s1351_s8, %s1118_s15 }
  0x41   : > { %p1115_p12 = pnand %p1113_p9, %p1099_p5  ;;  %p1121_p13 = scmp.lt.s32.totalorder %s1119_s29, %s1112_s11 }
  0x43   : > { %p1116_p7 = pneg %p1115_p12  ;;  %p1122_p3 = por %p1121_p13, %p1120_p0 }
  0x45   : > { %p1123_p1 = pnand %p1122_p3, %p1116_p7 }
  0x47   : > { %1126 = shalt.err (!%p1123_p1)
}
  0x48   : > { %1016 = dma.hbm_to_vmem [thread:$0]  (!%p1353_p11), %s1349_s16, 128, %s1351_s8, %s208_s17  }
  0x49   : > { %242 = sbr.rel (%p1285_p8) target bundleno = 304 (0x130), region = 40  ;;  %p1832_p5 = scmp.eq.s32.totalorder (!%p1285_p8), %s1266_s22, 0 }
  0x50   : > { %1172 = dma.done.wait (%p1832_p5), [#allocation5], 16   ;;  %p1833_p10 = pmov %p1832_p5 }
  0x51   : > { %p1834_p6 = pmov %p1832_p5 }
  0x52   : > { %1174 = vsyncadd (%p1833_p10), [#allocation5], 4294967280 }
  0x53   : > { %1176 = dma.done.wait (%p1834_p6), [#allocation6], 16   ;;  %p1835_p0 = pmov %p1832_p5 }
  0x54   : > { %s1393_s9 = sand.u32 1, %s1193_s19   ;;  %p1836_p8 = scmp.ne.s32.totalorder %s1824_s24, 0 }
  0x55   : > { %1178 = vsyncadd (%p1835_p0), [#allocation6], 4294967280  ;;  %s947_s26 = sshll.u32 %s1393_s9, 3  ;;  %s253_s16 = scalar_lea.sflag [#allocation3], %s1393_s9 }
  0x56   : > { %s1399_s8 = scalar_lea.vmem [#allocation8], %s947_s26 }
  0x57   : > { %1180 = dma.done.wait (%p1836_p8), %s253_s16, 128  }
  0x58   : > { %1182 = vsyncadd (%p1836_p8), %s253_s16, 4294967168 }
  0x59   : > { %261 = sfence }
  0x5a   : > { %p292_p11 = scmp.lt.s32.totalorder %s1266_s22, 1  ;;  %v302_v0 = vlaneseq  ;;  %s1206_s11 = smov 17  }
  0x5b   : > { %s1207_s14 = smov 16   ;;  %s967_s15 = sld [smem:[#allocation2 + $0x4]] }
  0x5c   : > { %s293_s17 = scalar_select %p292_p11, %s1266_s22, 1  ;;  %v324_v1 = vshrl.u32 %v302_v0, 7  ;;  %v1439_v22 = vand.u32 127, %v302_v0 }
  0x5d   : > { %s969_s29 = sld [smem:[#allocation2 + $0x16]]  ;;  %s968_s16 = sld [smem:[#allocation2 + $0xd]] }
  0x5e   : > { %s949_s23 = sshll.u32 %s293_s17, 1  ;;  %v1408_v2 = vsub.s32 0, %v324_v1  ;;  %v1416_v3 = vsub.s32 1, %v324_v1  ;;  %s970_s17 = sld [smem:[#allocation2 + $0x1f]]  ;;  %v1442_v23 = vadd.s32 128, %v1439_v22  ;;  %v305_v24 = vand.u32 15, %v1439_v22 }
  0x5f   : > { %s299_s7 = scalar_lea.vmem %s1819_s4, %s949_s23  ;;  %s295_s24 = scalar_lea.vmem %s1818_s3, %s949_s23  ;;  %vm307_vm0 = vcmp.ge.s32.totalorder %v1439_v22, 16  ;;  %vm351_vm2 = vcmp.lt.s32.totalorder %v1439_v22, 17  ;;  %vm398_vm5 = vcmp.lt.s32.totalorder %v1439_v22, 16  ;;  %vm443_vm7 = vcmp.lt.s32.totalorder %v1439_v22, 15 }
  0x60   : > { %v301_v4 = vld [vmem:[%s299_s7] sm:$0x3]  ;;  %s1208_s23 = smov 15   ;;  %s1209_s27 = smov 1   ;;  %v306_v25 = vand.u32 15, %v1442_v23  ;;  %vm1463_vm1 = vcmp.ge.s32.totalorder %v305_v24, 1 }
  0x61   : > { %v300_v5 = vld [vmem:[%s295_s24] sm:$0x3]  ;;  %v334_v6 = vrot.slane %v301_v4, %v1408_v2  ;;  %v338_v8 = vrot.slane %v301_v4, %v1416_v3  ;;  %v528_v10 = vstv %s967_s15  ;;  %s1210_s28 = smov 127   ;;  %s1211_s7 = smov 113   ;;  %vm1482_vm4 = vmand %vm307_vm0, %vm1463_vm1  ;;  %vm1495_vm6 = vcmp.lt.s32.totalorder %v305_v24, 15 }
  0x62   : > { %v326_v7 = vrot.slane %v300_v5, %v1408_v2  ;;  %v330_v9 = vrot.slane %v300_v5, %v1416_v3  ;;  %v1422_v12 = vmul.f32 %v528_v10, %v300_v5  ;;  %s1212_s12 = smov 112   ;;  %s1213_s13 = smov 111   ;;  %vm1474_vm3 = vcmp.ge.s32.totalorder %v306_v25, 1  ;;  %vm1557_vm10 = vmand %vm307_vm0, %vm1495_vm6 }
  0x63   : > { %345 = vrot.lane.b32.xlu1 %v334_v6, %s1206_s11  ;;  %v560_v11 = vstv %s969_s29  ;;  %v544_v14 = vstv %s968_s16  ;;  %s1444_s24 = sld [smem:[#allocation2 + $0x9]]  ;;  %s1451_s15 = sld [smem:[#allocation2]]  ;;  %vm1520_vm8 = vcmp.lt.s32.totalorder %v306_v25, 15  ;;  %vm490_vm9 = vcmp.lt.s32.totalorder %v1439_v22, 1 }
  0x64   : > { %343 = vrot.lane.b32.xlu0 %v326_v7, %s1206_s11  ;;  %v1424_v13 = vmul.f32 %v560_v11, %v300_v5  ;;  %v576_v15 = vstv %s970_s17  ;;  %v1426_v16 = vmul.f32 %v544_v14, %v301_v4  ;;  %v538_v18 = vrot.slane %v1422_v12, %v1416_v3  ;;  %s1453_s29 = sld [smem:[#allocation2 + $0x12]]  ;;  %s1455_s16 = sld [smem:[#allocation7 + $0x1]] }
  0x65   : > { %v1428_v17 = vmul.f32 %v576_v15, %v301_v4  ;;  %s1458_s17 = sld [smem:[#allocation2 + $0x1]]  ;;  %vm599_vm11 = vcmp.lt.s32.totalorder %v1439_v22, 127  ;;  %vm310_vm12 = vcmp.lt.s32.totalorder %v1442_v23, 240  ;;  %vm644_vm13 = vcmp.lt.s32.totalorder %v1439_v22, 113  ;;  %p1853_p4 = scmp.ne.s32.totalorder %s1830_s6, 0 }
  0x66   : > { %v570_v19 = vrot.slane %v1424_v13, %v1416_v3  ;;  %v554_v20 = vrot.slane %v1426_v16, %v1416_v3  ;;  %vm1672_vm14 = vmand %vm310_vm12, %vm1474_vm3  ;;  %vm691_vm15 = vcmp.lt.s32.totalorder %v1439_v22, 112 }
  0x67   : > { %349 = vrot.lane.b32.xlu1 %v338_v8, %s1206_s11  ;;  %v586_v21 = vrot.slane %v1428_v17, %v1416_v3 }
  0x68   : > { %347 = vrot.lane.b32.xlu0 %v330_v9, %s1206_s11  ;;  %s1446_s11 = sld [smem:[#allocation2 + $0x1b]] }
  0x69   : > { %v373_v31 = vstv %s1444_s24  ;;  %v367_v35 = vstv %s1451_s15  ;;  %s1506_s24 = sld [smem:[#allocation2 + $0x1d]]  ;;  %s1537_s15 = sld [smem:[#allocation2 + $0xc]] }
  0x6a   : > { %v379_v39 = vstv %s1453_s29  ;;  %v319_v42 = vstv %s1455_s16  ;;  %s1543_s29 = sld [smem:[#allocation2 + $0x1e]]  ;;  %s1582_s16 = sld [smem:[#allocation2 + $0x5]] }
  0x6b   : > { %394 = vrot.lane.b32.xlu1 %v330_v9, %s1207_s14  ;;  %v412_v47 = vstv %s1458_s17  ;;  %s1584_s17 = sld [smem:[#allocation2 + $0x17]] }
  0x6c   : > { %390 = vrot.lane.b32.xlu0 %v326_v7, %s1207_s14 }
  0x6e   : > { %v385_v32 = vstv %s1446_s11  ;;  %s1524_s11 = sld [smem:[#allocation2 + $0x3]] }
  0x6f   : > { %396 = vrot.lane.b32.xlu1 %v338_v8, %s1207_s14  ;;  %v477_v25 = vstv %s1506_s24  ;;  %s1676_s24 = sld [smem:[#allocation2 + $0x7]] }
  0x70   : > { %392 = vrot.lane.b32.xlu0 %v334_v6, %s1207_s14  ;;  %s1449_s14 = sld [smem:[#allocation7]] }
  0x73   : > { %439 = vrot.lane.b32.xlu1 %v330_v9, %s1208_s23 }
  0x74   : > { %435 = vrot.lane.b32.xlu0 %v326_v7, %s1208_s23 }
  0x76   : > { %v316_v34 = vstv %s1449_s14  ;;  %s1535_s14 = sld [smem:[#allocation2 + $0x15]] }
  0x77   : > { %441 = vrot.lane.b32.xlu1 %v338_v8, %s1208_s23 }
  0x78   : > { %437 = vrot.lane.b32.xlu0 %v334_v6, %s1208_s23  ;;  %s1460_s23 = sld [smem:[#allocation2 + $0x13]] }
  0x7b   : > { %486 = vrot.lane.b32.xlu1 %v330_v9, %s1209_s27 }
  0x7c   : > { %482 = vrot.lane.b32.xlu0 %v326_v7, %s1209_s27 }
  0x7e   : > { %v424_v48 = vstv %s1460_s23  ;;  %s1598_s23 = sld [smem:[#allocation2 + $0xe]] }
  0x7f   : > { %488 = vrot.lane.b32.xlu1 %v338_v8, %s1209_s27 }
  0x80   : > { %484 = vrot.lane.b32.xlu0 %v334_v6, %s1209_s27  ;;  %s1467_s27 = sld [smem:[#allocation2 + $0xa]] }
  0x83   : > { %595 = vrot.lane.b32.xlu1 %v330_v9, %s1210_s28 }
  0x84   : > { %591 = vrot.lane.b32.xlu0 %v326_v7, %s1210_s28 }
  0x86   : > { %v418_v58 = vstv %s1467_s27  ;;  %s1600_s27 = sld [smem:[#allocation2 + $0x20]] }
  0x87   : > { %597 = vrot.lane.b32.xlu1 %v338_v8, %s1210_s28 }
  0x88   : > { %593 = vrot.lane.b32.xlu0 %v334_v6, %s1210_s28  ;;  %s1469_s28 = sld [smem:[#allocation2 + $0x1c]] }
  0x8b   : > { %640 = vrot.lane.b32.xlu1 %v330_v9, %s1211_s7 }
  0x8c   : > { %636 = vrot.lane.b32.xlu0 %v326_v7, %s1211_s7 }
  0x8e   : > { %v430_v59 = vstv %s1469_s28  ;;  %s1620_s28 = sld [smem:[#allocation2 + $0x6]] }
  0x8f   : > { %642 = vrot.lane.b32.xlu1 %v338_v8, %s1211_s7 }
  0x90   : > { %638 = vrot.lane.b32.xlu0 %v334_v6, %s1211_s7  ;;  %s1472_s7 = sld [smem:[#allocation2 + $0x2]] }
  0x93   : > { %687 = vrot.lane.b32.xlu1 %v330_v9, %s1212_s12 }
  0x94   : > { %683 = vrot.lane.b32.xlu0 %v326_v7, %s1212_s12 }
  0x96   : > { %v459_v63 = vstv %s1472_s7  ;;  %s1622_s7 = sld [smem:[#allocation2 + $0x18]] }
  0x97   : > { %689 = vrot.lane.b32.xlu1 %v338_v8, %s1212_s12 }
  0x98   : > { %685 = vrot.lane.b32.xlu0 %v334_v6, %s1212_s12  ;;  %s1488_s12 = sld [smem:[#allocation2 + $0x14]] }
  0x9b   : > { %732 = vrot.lane.b32.xlu1 %v330_v9, %s1213_s13 }
  0x9c   : > { %728 = vrot.lane.b32.xlu0 %v326_v7, %s1213_s13 }
  0x9e   : > { %v471_v4 = vstv %s1488_s12  ;;  %s1640_s12 = sld [smem:[#allocation2 + $0xf]] }
  0x9f   : > { %734 = vrot.lane.b32.xlu1 %v338_v8, %s1213_s13 }
  0xa0   : > { %730 = vrot.lane.b32.xlu0 %v334_v6, %s1213_s13  ;;  %s1490_s13 = sld [smem:[#allocation2 + $0xb]] }
  0xa6   : > { %v465_v5 = vstv %s1490_s13  ;;  %s1660_s13 = sld [smem:[#allocation2 + $0x21]] }
  0xd5   : > { %v346_v26 = vpop.permute.xlu1 %345 }
  0xd6   : > { %v344_v27 = vpop.permute.xlu0 %343 }
  0xd9   : > { %v350_v33 = vpop.permute.xlu1 %349 }
  0xda   : > { %v348_v36 = vpop.permute.xlu0 %347  ;;  %v353_v38 = vsel %vm351_vm2, %v346_v26, %v350_v33  ;;  %v355_v45 = vsel %vm351_vm2, %v350_v33, %v346_v26 }
  0xdb   : > { %v352_v40 = vsel %vm351_vm2, %v344_v27, %v348_v36  ;;  %v354_v41 = vsel %vm351_vm2, %v348_v36, %v344_v27  ;;  %v365_v46 = vsel %vm1474_vm3, %v353_v38, 0.0  ;;  %v364_v60 = vsel %vm1482_vm4, %v355_v45, 0.0 }
  0xdc   : > { %v362_v43 = vsel %vm1482_vm4, %v354_v41, 0.0  ;;  %v363_v44 = vsel %vm1474_vm3, %v352_v40, 0.0  ;;  %v375_v61 = vmul.f32 %v373_v31, %v365_v46  ;;  %v374_v14 = vmul.f32 %v373_v31, %v364_v60 }
  0xdd   : > { %v368_v50 = vmul.f32 %v367_v35, %v362_v43  ;;  %v369_v51 = vmul.f32 %v367_v35, %v363_v44  ;;  %v380_v52 = vmul.f32 %v379_v39, %v362_v43  ;;  %v381_v53 = vmul.f32 %v379_v39, %v363_v44  ;;  %v395_v54 = vpop.permute.xlu1 %394 }
  0xde   : > { %v391_v55 = vpop.permute.xlu0 %390  ;;  %v387_v15 = vmul.f32 %v385_v32, %v365_v46  ;;  %v386_v26 = vmul.f32 %v385_v32, %v364_v60 }
  0xdf   : > { %v399_v56 = vsel %vm398_vm5, %v391_v55, %v395_v54  ;;  %v401_v57 = vsel %vm398_vm5, %v395_v54, %v391_v55  ;;  %v371_v62 = vadd.f32 %v369_v51, %v316_v34  ;;  %v370_v0 = vadd.f32 %v368_v50, %v316_v34 }
  0xe0   : > { %v383_v1 = vadd.f32 %v381_v53, %v319_v42  ;;  %v382_v6 = vadd.f32 %v380_v52, %v319_v42  ;;  %v407_v8 = vsel %vm307_vm0, %v401_v57, 0.0  ;;  %v414_v9 = vmul.f32 %v412_v47, %v399_v56 }
  0xe1   : > { %v377_v7 = vadd.f32 %v375_v61, %v371_v62  ;;  %v397_v10 = vpop.permute.xlu1 %396  ;;  %v376_v33 = vadd.f32 %v374_v14, %v370_v0  ;;  %v413_v35 = vmul.f32 %v412_v47, %v407_v8  ;;  %v426_v31 = vmul.f32 %v424_v48, %v399_v56 }
  0xe2   : > { %v393_v11 = vpop.permute.xlu0 %392  ;;  %v389_v34 = vadd.f32 %v387_v15, %v383_v1  ;;  %v388_v36 = vadd.f32 %v386_v26, %v382_v6  ;;  %v425_v39 = vmul.f32 %v424_v48, %v407_v8  ;;  %v504_v42 = vstv %s1524_s11  ;;  %s1678_s11 = sld [smem:[#allocation2 + $0x19]] }
  0xe3   : > { %v402_v24 = vsel %vm398_vm5, %v397_v10, %v393_v11  ;;  %v400_v27 = vsel %vm398_vm5, %v393_v11, %v397_v10  ;;  %v416_v38 = vadd.f32 %v414_v9, %v377_v7  ;;  %v516_v51 = vstv %s1535_s14  ;;  %s1688_s14 = sld [smem:[#allocation2 + $0x10]] }
  0xe4   : > { %v409_v30 = vsel %vm307_vm0, %v402_v24, 0.0  ;;  %v420_v44 = vmul.f32 %v418_v58, %v400_v27  ;;  %v510_v48 = vstv %s1537_s15  ;;  %v415_v52 = vadd.f32 %v413_v35, %v376_v33  ;;  %s1690_s15 = sld [smem:[#allocation2 + $0x22]] }
  0xe5   : > { %v440_v40 = vpop.permute.xlu1 %439  ;;  %v419_v43 = vmul.f32 %v418_v58, %v409_v30  ;;  %v428_v53 = vadd.f32 %v426_v31, %v389_v34  ;;  %v431_v54 = vmul.f32 %v430_v59, %v409_v30  ;;  %v432_v55 = vmul.f32 %v430_v59, %v400_v27 }
  0xe6   : > { %v436_v41 = vpop.permute.xlu0 %435  ;;  %v522_v61 = vstv %s1543_s29  ;;  %v534_v62 = vrot.slane %v1422_v12, %v1408_v2  ;;  %v427_v0 = vadd.f32 %v425_v39, %v388_v36  ;;  %v422_v6 = vadd.f32 %v420_v44, %v416_v38  ;;  %s1709_s29 = sld [smem:[#allocation2 + $0x8]] }
  0xe7   : > { %v444_v45 = vsel %vm443_vm7, %v436_v41, %v440_v40  ;;  %v446_v46 = vsel %vm443_vm7, %v440_v40, %v436_v41  ;;  %v421_v1 = vadd.f32 %v419_v43, %v415_v52  ;;  %v566_v7 = vrot.slane %v1424_v13, %v1408_v2 }
  0xe8   : > { %v454_v47 = vsel %vm1557_vm10, %v446_v46, 0.0  ;;  %v455_v50 = vsel %vm1520_vm8, %v444_v45, 0.0  ;;  %v433_v10 = vadd.f32 %v431_v54, %v427_v0  ;;  %v434_v11 = vadd.f32 %v432_v55, %v428_v53 }
  0xe9   : > { %v460_v56 = vmul.f32 %v459_v63, %v454_v47  ;;  %v461_v57 = vmul.f32 %v459_v63, %v455_v50  ;;  %v442_v58 = vpop.permute.xlu1 %441  ;;  %v472_v8 = vmul.f32 %v471_v4, %v454_v47  ;;  %v473_v9 = vmul.f32 %v471_v4, %v455_v50 }
  0xea   : > { %v438_v60 = vpop.permute.xlu0 %437  ;;  %v550_v39 = vrot.slane %v1426_v16, %v1408_v2  ;;  %v625_v0 = vstv %s1584_s17  ;;  %vm736_vm0 = vcmp.lt.s32.totalorder %v1439_v22, 111  ;;  %s1722_s17 = sld [smem:[#allocation2 + $0x11]] }
  0xeb   : > { %v445_v59 = vsel %vm443_vm7, %v438_v60, %v442_v58  ;;  %v447_v63 = vsel %vm443_vm7, %v442_v58, %v438_v60  ;;  %v462_v15 = vadd.f32 %v460_v56, %v421_v1  ;;  %v463_v24 = vadd.f32 %v461_v57, %v422_v6 }
  0xec   : > { %v456_v14 = vsel %vm1557_vm10, %v447_v63, 0.0  ;;  %v457_v4 = vsel %vm1520_vm8, %v445_v59, 0.0  ;;  %v474_v36 = vadd.f32 %v472_v8, %v433_v10  ;;  %v475_v38 = vadd.f32 %v473_v9, %v434_v11 }
  0xed   : > { %v466_v26 = vmul.f32 %v465_v5, %v456_v14  ;;  %v467_v27 = vmul.f32 %v465_v5, %v457_v4  ;;  %v487_v30 = vpop.permute.xlu1 %486  ;;  %v478_v34 = vmul.f32 %v477_v25, %v456_v14  ;;  %v479_v35 = vmul.f32 %v477_v25, %v457_v4 }
  0xee   : > { %v483_v33 = vpop.permute.xlu0 %482  ;;  %v582_v5 = vrot.slane %v1428_v17, %v1408_v2  ;;  %v613_v60 = vstv %s1582_s16  ;;  %s1711_s16 = sld [smem:[#allocation2 + $0x1a]] }
  0xef   : > { %v491_v31 = vsel %vm490_vm9, %v483_v33, %v487_v30  ;;  %v493_v32 = vsel %vm490_vm9, %v487_v30, %v483_v33  ;;  %v468_v40 = vadd.f32 %v466_v26, %v462_v15  ;;  %v469_v25 = vadd.f32 %v467_v27, %v463_v24 }
  0xf0   : > { %v499_v41 = vsel %vm1463_vm1, %v493_v32, 0.0  ;;  %v500_v43 = vsel %vm1474_vm3, %v491_v31, 0.0  ;;  %v480_v53 = vadd.f32 %v478_v34, %v474_v36  ;;  %v481_v54 = vadd.f32 %v479_v35, %v475_v38 }
  0xf1   : > { %v505_v44 = vmul.f32 %v504_v42, %v499_v41  ;;  %v506_v45 = vmul.f32 %v504_v42, %v500_v43  ;;  %v517_v46 = vmul.f32 %v516_v51, %v499_v41  ;;  %v518_v47 = vmul.f32 %v516_v51, %v500_v43  ;;  %v489_v50 = vpop.permute.xlu1 %488 }
  0xf2   : > { %v485_v52 = vpop.permute.xlu0 %484  ;;  %v619_v15 = vstv %s1598_s23  ;;  %v631_v24 = vstv %s1600_s27  ;;  %s1724_s23 = sld [smem:[#allocation2 + $0x23]]  ;;  %s993_s27 = sshll.u32 %s1266_s22, 7 }
  0xf3   : > { %v492_v55 = vsel %vm490_vm9, %v485_v52, %v489_v50  ;;  %v494_v56 = vsel %vm490_vm9, %v489_v50, %v485_v52  ;;  %v507_v57 = vadd.f32 %v505_v44, %v468_v40  ;;  %v508_v58 = vadd.f32 %v506_v45, %v469_v25  ;;  %s1214_s22 = smov [#allocation9]  }
  0xf4   : > { %v519_v42 = vadd.f32 %v517_v46, %v480_v53  ;;  %v520_v51 = vadd.f32 %v518_v47, %v481_v54  ;;  %v501_v1 = vsel %vm1463_vm1, %v494_v56, 0.0  ;;  %v502_v6 = vsel %vm1474_vm3, %v492_v55, 0.0 }
  0xf5   : > { %v511_v8 = vmul.f32 %v510_v48, %v501_v1  ;;  %v512_v9 = vmul.f32 %v510_v48, %v502_v6  ;;  %v523_v59 = vmul.f32 %v522_v61, %v501_v1  ;;  %v524_v63 = vmul.f32 %v522_v61, %v502_v6  ;;  %v596_v10 = vpop.permute.xlu1 %595 }
  0xf6   : > { %v592_v11 = vpop.permute.xlu0 %591  ;;  %v660_v44 = vstv %s1620_s28  ;;  %v672_v45 = vstv %s1622_s7  ;;  %s291_s28 = scalar_lea.vmem [#allocation9], %s947_s26  ;;  %s1131_s26 = sshll.u32 %s1214_s22, 4  ;;  %s1132_s26 = int_to_ptr.vmem [resolvable:$false] %s1131_s26 }
  0xf7   : > { %v600_v14 = vsel %vm599_vm11, %v592_v11, %v596_v10  ;;  %v602_v4 = vsel %vm599_vm11, %v596_v10, %v592_v11  ;;  %v513_v26 = vadd.f32 %v511_v8, %v507_v57  ;;  %v514_v27 = vadd.f32 %v512_v9, %v508_v58  ;;  %s818_s7 = sshll.u32 %s291_s28, 4  ;;  %s1773_s7 = int_to_ptr.vmem [resolvable:$true] %s818_s7 }
  0xf8   : > { %v525_v30 = vadd.f32 %v523_v59, %v519_v42  ;;  %v526_v33 = vadd.f32 %v524_v63, %v520_v51  ;;  %v608_v34 = vsel %vm1495_vm6, %v600_v14, 0.0  ;;  %v609_v48 = vsel %vm1520_vm8, %v602_v4, 0.0  ;;  %p1134_p7 = scmp.lt.s32.totalorder %s1773_s7, %s1132_s26 }
  0xf9   : > { %v541_v61 = vadd.f32 %v534_v62, %v513_v26  ;;  %v542_v35 = vadd.f32 %v538_v18, %v514_v27  ;;  %v598_v36 = vpop.permute.xlu1 %597  ;;  %v614_v40 = vmul.f32 %v613_v60, %v608_v34  ;;  %v615_v25 = vmul.f32 %v613_v60, %v609_v48 }
  0xfa   : > { %v573_v31 = vadd.f32 %v566_v7, %v525_v30  ;;  %v574_v32 = vadd.f32 %v570_v19, %v526_v33  ;;  %v594_v38 = vpop.permute.xlu0 %593  ;;  %v626_v41 = vmul.f32 %v625_v0, %v608_v34  ;;  %v627_v62 = vmul.f32 %v625_v0, %v609_v48 }
  0xfb   : > { %v557_v43 = vadd.f32 %v550_v39, %v541_v61  ;;  %v558_v12 = vadd.f32 %v554_v20, %v542_v35  ;;  %v601_v13 = vsel %vm599_vm11, %v594_v38, %v598_v36  ;;  %v603_v19 = vsel %vm599_vm11, %v598_v36, %v594_v38 }
  0xfc   : > { %v589_v18 = vadd.f32 %v582_v5, %v573_v31  ;;  %v590_v7 = vadd.f32 %v586_v21, %v574_v32  ;;  %v610_v21 = vsel %vm1495_vm6, %v601_v13, 0.0  ;;  %v611_v5 = vsel %vm1520_vm8, %v603_v19, 0.0 }
  0xfd   : > { %v616_v39 = vadd.f32 %v614_v40, %v557_v43  ;;  %v617_v46 = vadd.f32 %v615_v25, %v558_v12  ;;  %v641_v20 = vpop.permute.xlu1 %640  ;;  %v620_v52 = vmul.f32 %v619_v15, %v610_v21  ;;  %v621_v53 = vmul.f32 %v619_v15, %v611_v5 }
  0xfe   : > { %v628_v47 = vadd.f32 %v626_v41, %v589_v18  ;;  %v629_v16 = vadd.f32 %v627_v62, %v590_v7  ;;  %v637_v17 = vpop.permute.xlu0 %636  ;;  %v632_v54 = vmul.f32 %v631_v24, %v610_v21  ;;  %v633_v55 = vmul.f32 %v631_v24, %v611_v5 }
  0xff   : > { %v645_v29 = vsel %vm644_vm13, %v637_v17, %v641_v20  ;;  %v647_v50 = vsel %vm644_vm13, %v641_v20, %v637_v17  ;;  %v666_v58 = vstv %s1640_s12  ;;  %v622_v60 = vadd.f32 %v620_v52, %v616_v39 }
 0x100   : > { %v655_v56 = vsel %vm1463_vm1, %v645_v29, 0.0  ;;  %v656_v57 = vsel %vm1672_vm14, %v647_v50, 0.0  ;;  %v623_v0 = vadd.f32 %v621_v53, %v617_v46  ;;  %v634_v42 = vadd.f32 %v632_v54, %v628_v47 }
 0x101   : > { %v635_v51 = vadd.f32 %v633_v55, %v629_v16  ;;  %v643_v1 = vpop.permute.xlu1 %642  ;;  %v661_v8 = vmul.f32 %v660_v44, %v655_v56  ;;  %v662_v9 = vmul.f32 %v660_v44, %v656_v57  ;;  %v673_v59 = vmul.f32 %v672_v45, %v655_v56 }
 0x102   : > { %v639_v6 = vpop.permute.xlu0 %638  ;;  %v674_v63 = vmul.f32 %v672_v45, %v656_v57  ;;  %v678_v10 = vstv %s1660_s13  ;;  %v705_v34 = vstv %s1676_s24  ;;  %v717_v48 = vstv %s1678_s11  ;;  %s1771_s24 = scalar_lea.hbm %s1820_s5, %s993_s27  ;;  %s1127_s11 = scalar_lea.vmem %s1773_s7, 128 }
 0x103   : > { %v646_v11 = vsel %vm644_vm13, %v639_v6, %v643_v1  ;;  %v648_v14 = vsel %vm644_vm13, %v643_v1, %v639_v6  ;;  %v663_v4 = vadd.f32 %v661_v8, %v622_v60  ;;  %v664_v15 = vadd.f32 %v662_v9, %v623_v0  ;;  %p1128_p2 = scmp.ne.s32.totalorder %s1773_s7, %s1127_s11 }
 0x104   : > { %v675_v24 = vadd.f32 %v673_v59, %v634_v42  ;;  %v676_v26 = vadd.f32 %v674_v63, %v635_v51  ;;  %v657_v27 = vsel %vm1463_vm1, %v646_v11, 0.0  ;;  %v658_v30 = vsel %vm1672_vm14, %v648_v14, 0.0  ;;  %vm1736_vm1 = vmand %vm310_vm12, %vm1520_vm8 }
 0x105   : > { %v688_v33 = vpop.permute.xlu1 %687  ;;  %v667_v35 = vmul.f32 %v666_v58, %v657_v27  ;;  %v668_v31 = vmul.f32 %v666_v58, %v658_v30  ;;  %v679_v32 = vmul.f32 %v678_v10, %v657_v27  ;;  %v680_v36 = vmul.f32 %v678_v10, %v658_v30  ;;  %p1129_p9 = pnand %p1128_p2, %p1853_p4 }
 0x106   : > { %v684_v61 = vpop.permute.xlu0 %683  ;;  %v711_v40 = vstv %s1688_s14  ;;  %v723_v25 = vstv %s1690_s15  ;;  %v752_v56 = vstv %s1709_s29  ;;  %v764_v57 = vstv %s1711_s16  ;;  %s1133_s14 = scalar_lea.vmem %s1132_s26, 256 }
 0x107   : > { %v692_v28 = vsel %vm691_vm15, %v684_v61, %v688_v33  ;;  %v694_v38 = vsel %vm691_vm15, %v688_v33, %v684_v61  ;;  %v669_v41 = vadd.f32 %v667_v35, %v663_v4  ;;  %v670_v62 = vadd.f32 %v668_v31, %v664_v15  ;;  %p1130_p12 = pneg %p1129_p9  ;;  %p1135_p13 = scmp.lt.s32.totalorder %s1133_s14, %s1127_s11 }
 0x108   : > { %v681_v43 = vadd.f32 %v679_v32, %v675_v24  ;;  %v682_v12 = vadd.f32 %v680_v36, %v676_v26  ;;  %v701_v18 = vsel %vm310_vm12, %v694_v38, 0.0  ;;  %v706_v7 = vmul.f32 %v705_v34, %v692_v28 }
 0x109   : > { %v718_v13 = vmul.f32 %v717_v48, %v692_v28  ;;  %v690_v19 = vpop.permute.xlu1 %689  ;;  %v707_v45 = vmul.f32 %v705_v34, %v701_v18  ;;  %v719_v39 = vmul.f32 %v717_v48, %v701_v18  ;;  %v758_v10 = vstv %s1722_s17  ;;  %p1136_p3 = por %p1135_p13, %p1134_p7 }
 0x10a   : > { %v686_v44 = vpop.permute.xlu0 %685  ;;  %v708_v16 = vadd.f32 %v706_v7, %v669_v41  ;;  %v770_v11 = vstv %s1724_s23  ;;  %v775_v41 = vld [vmem:[%s1399_s8] sm:$0xff]  ;;  %s804_s8 = scalar_lea.sflag [#allocation4], %s1393_s9 }
 0x10b   : > { %v693_v46 = vsel %vm691_vm15, %v686_v44, %v690_v19  ;;  %v695_v47 = vsel %vm691_vm15, %v690_v19, %v686_v44  ;;  %v720_v20 = vadd.f32 %v718_v13, %v681_v43  ;;  %v709_v21 = vadd.f32 %v707_v45, %v670_v62  ;;  %p1137_p1 = pnand %p1136_p3, %p1130_p12 }
 0x10c   : > { %v703_v3 = vsel %vm310_vm12, %v695_v47, 0.0  ;;  %v712_v17 = vmul.f32 %v711_v40, %v693_v46  ;;  %v721_v5 = vadd.f32 %v719_v39, %v682_v12  ;;  %v724_v50 = vmul.f32 %v723_v25, %v693_v46 }
 0x10d   : > { %v713_v29 = vmul.f32 %v711_v40, %v703_v3  ;;  %v725_v54 = vmul.f32 %v723_v25, %v703_v3  ;;  %v733_v55 = vpop.permute.xlu1 %732 }
 0x10e   : > { %v714_v53 = vadd.f32 %v712_v17, %v708_v16  ;;  %v729_v58 = vpop.permute.xlu0 %728  ;;  %v726_v0 = vadd.f32 %v724_v50, %v720_v20 }
 0x10f   : > { %v715_v60 = vadd.f32 %v713_v29, %v709_v21  ;;  %v737_v42 = vsel %vm736_vm0, %v729_v58, %v733_v55  ;;  %v739_v23 = vsel %vm736_vm0, %v733_v55, %v729_v58  ;;  %v727_v49 = vadd.f32 %v725_v54, %v721_v5 }
 0x110   : > { %v747_v51 = vsel %vm1495_vm6, %v737_v42, 0.0  ;;  %v748_v1 = vsel %vm1736_vm1, %v739_v23, 0.0 }
 0x111   : > { %v753_v6 = vmul.f32 %v752_v56, %v747_v51  ;;  %v754_v8 = vmul.f32 %v752_v56, %v748_v1  ;;  %v765_v9 = vmul.f32 %v764_v57, %v747_v51  ;;  %v766_v59 = vmul.f32 %v764_v57, %v748_v1  ;;  %v735_v63 = vpop.permute.xlu1 %734 }
 0x112   : > { %v731_v14 = vpop.permute.xlu0 %730 }
 0x113   : > { %v755_v4 = vadd.f32 %v753_v6, %v714_v53  ;;  %v756_v15 = vadd.f32 %v754_v8, %v715_v60  ;;  %v767_v24 = vadd.f32 %v765_v9, %v726_v0  ;;  %v768_v26 = vadd.f32 %v766_v59, %v727_v49 }
 0x114   : > { %v738_v27 = vsel %vm736_vm0, %v731_v14, %v735_v63  ;;  %v740_v30 = vsel %vm736_vm0, %v735_v63, %v731_v14 }
 0x115   : > { %v749_v33 = vsel %vm1495_vm6, %v738_v27, 0.0  ;;  %v750_v34 = vsel %vm1736_vm1, %v740_v30, 0.0 }
 0x116   : > { %v759_v48 = vmul.f32 %v758_v10, %v749_v33  ;;  %v760_v61 = vmul.f32 %v758_v10, %v750_v34  ;;  %v771_v35 = vmul.f32 %v770_v11, %v749_v33  ;;  %v772_v31 = vmul.f32 %v770_v11, %v750_v34 }
 0x118   : > { %v761_v32 = vadd.f32 %v759_v48, %v755_v4  ;;  %v762_v36 = vadd.f32 %v760_v61, %v756_v15  ;;  %v773_v28 = vadd.f32 %v771_v35, %v767_v24  ;;  %v774_v38 = vadd.f32 %v772_v31, %v768_v26 }
 0x11a   : > { %v779_v22 = vrot.slane %v773_v28, %v1408_v2  ;;  %v783_v40 = vrot.slane %v774_v38, %v1408_v2  ;;  %v792_v37 = vrot.slane %v761_v32, %v1408_v2  ;;  %v796_v25 = vrot.slane %v762_v36, %v1408_v2 }
 0x11c   : > { %v786_v62 = vcombine.low %v779_v22, %v783_v40  ;;  %v799_v43 = vcombine.low %v792_v37, %v796_v25 }
 0x11e   : > { %v788_v12 = vmul.f32 %v786_v62, %v775_v41 }
 0x120   : > { %v801_v18 = vadd.f32 %v799_v43, %v788_v12 }
 0x122   : > { %802 = vst [vmem:[%s291_s28] sm:$0xff] %v801_v18 }
 0x123   : > { %1140 = shalt.err (!%p1137_p1)
}
 0x124   : > { %s1141_s9 = scalar_lea.hbm %s1771_s24, 128  ;;  %s1145_s16 = scalar_lea.hbm %s1820_s5, 256 }
 0x125   : > { %p1142_p5 = scmp.ne.s32.totalorder %s1771_s24, %s1141_s9  ;;  %p1146_p0 = scmp.lt.u32.totalorder %s1771_s24, %s1820_s5 }
 0x126   : > { %p1147_p8 = scmp.lt.u32.totalorder %s1145_s16, %s1141_s9  ;;  %p1149_p2 = scmp.lt.u32.totalorder %s1141_s9, %s1771_s24 }
 0x127   : > { %p1143_p10 = pnand %p1142_p5, %p1853_p4 }
 0x128   : > { %p1148_p11 = por %p1147_p8, %p1146_p0 }
 0x129   : > { %p1144_p6 = pneg %p1143_p10 }
 0x12a   : > { %p1150_p9 = por %p1149_p2, %p1148_p11 }
 0x12c   : > { %p1151_p12 = pnand %p1150_p9, %p1144_p6 }
 0x12e   : > { %1154 = shalt.err (!%p1151_p12)
}
 0x12f   : > { %1004 = dma.vmem_to_hbm [thread:$0]  (%p1853_p4), %s1773_s7, 128, %s1771_s24, %s804_s8  }
 0x130 PF: > { %s830_s27 = sand.u32 1, %s1189_s18   ;;  %p1854_p7 = scmp.ne.s32.totalorder %s1825_s25, 0 }
 0x131   : > { %p1855_p13 = scmp.ge.s32.totalorder %s1201_s21, 2  ;;  %s831_s28 = scalar_lea.sflag [#allocation4], %s830_s27 }
 0x133   : > { %p1018_p3 = pnand %p1855_p13, %p1854_p7 }
 0x135   : > { %1184 = dma.done.wait (!%p1018_p3), %s831_s28, 128  }
 0x136   : > { %1186 = vsyncadd (!%p1018_p3), %s831_s28, 4294967168  ;;  %p20_p1 = scmp.ge.s32.totalorder %s1296_s30, 4   ;;  %s1856_s18 = smov %s1193_s19 }
 0x137   : > { %s1857_s19 = smov %s1197_s20  ;;  %s1858_s20 = smov %s1332_s10 }
 0x138   : > { %s1859_s21 = smov %s1296_s30  ;;  %22 = sbr.rel (!%p20_p1) target bundleno = 7 (0x7), region = 101 }
 0x13f   :  { %836 = vsyncpa [#allocation3], 1 }
 0x140   :  { %838 = vsyncpa [#allocation3 + $0x1], 1 }
 0x141   :  { %839 = vsyncpa [#allocation4], 1 }
 0x142   :  { %841 = vsyncpa [#allocation4 + $0x1], 1 }
 0x143   :  { %842 = vsyncpa [#allocation5], 1 }
 0x144   :  { %844 = vsyncpa [#allocation5 + $0x1], 1 }
 0x145   :  { %845 = vsyncpa [#allocation6], 1 }
 0x146   :  { %847 = vsyncpa [#allocation6 + $0x1], 1 }

</bundles_post_ra>
